<compile_context>
chip_gen: v7x
topology: tpu7x:2x2x1
jax: 0.10.0
libtpu: 0.0.40
codegen_flags: <defaults>
</compile_context>

<pallas_src>
import jax
import jax.numpy as jnp
from jax.experimental import pallas as pl
from jax.experimental.pallas import tpu as pltpu


def _vit_input_kernel(x_ref, wx_ref, bias_ref, o_ref):
    # x_ref   : (TS, Cin)  per-(seq-tile, batch) input tokens (batch squeezed)
    # wx_ref  : (Cin, F)   output-linear rows acting on x (VMEM resident)
    # bias_ref: (TS, F)    fp32 precomputed sin-Fourier contribution + out bias
    # o_ref   : (TS, F)
    acc = jnp.dot(x_ref[...], wx_ref[...], preferred_element_type=jnp.float32)
    o_ref[...] = (acc + bias_ref[...]).astype(o_ref.dtype)


def _round_up(v, m):
    return (v + m - 1) // m * m


def _vmem_capacity_bytes():
    try:
        return int(pltpu.get_tpu_info().vmem_capacity_bytes)
    except Exception:
        return 64 * 1024 * 1024  # conservative (v7x physical VMEM per TC)


def _pick_seq_tile(S, cin, f, x_itemsize, budget_bytes):
    """Largest multiple-of-8 divisor of S whose (padded, double-buffered) blocks fit."""
    if S % 8 != 0:
        # Full-extent block is always a legal BlockSpec; see TODO above for huge S.
        return S
    cin_lanes = _round_up(cin, 128)
    f_lanes = _round_up(f, 128)
    # Resident wx weight block (still double-buffered by the pipeline).
    fixed = 2 * _round_up(cin, 8) * f_lanes * x_itemsize
    # Per seq-row VMEM: double-buffered x block + fp32 bias block + out block.
    per_row = 2 * (cin_lanes * x_itemsize + f_lanes * 4 + f_lanes * x_itemsize)
    best = 8
    for ts in range(8, S + 1, 8):
        if S % ts:
            continue
        if fixed + ts * per_row <= budget_bytes:
            best = ts
    return best


def vit_input_pallas(x, params, height, width):
    """x: (B, S, Cin) with S = width*height (torch meshgrid 'ij' flatten order).

    Output dtype follows x.dtype; pass bf16 activations for half the HBM traffic
    on the dominant streams (f32 accumulation is kept inside the kernel).
    """
    B, S, Cin = x.shape
    assert S == height * width, "sequence length must equal height*width"

    Wp = params["proj_w"].astype(jnp.float32)   # (E, 2)
    bp = params["proj_b"].astype(jnp.float32)   # (E,)
    Wo = params["out_w"].astype(jnp.float32)    # (F, E+Cin)
    bo = params["out_b"].astype(jnp.float32)    # (F,)
    E = Wp.shape[0]
    F = Wo.shape[0]

    # ---- batch-invariant Fourier path: computed ONCE in the wrapper (fp32) ----
    xg, yg = jnp.meshgrid(
        jnp.arange(width, dtype=jnp.float32),
        jnp.arange(height, dtype=jnp.float32),
        indexing="ij",
    )
    # Divide by (W-1)/(H-1) exactly like the PyTorch module (no degenerate guard).
    x_norm = 2.0 * xg.reshape(-1) / jnp.float32(width - 1) - 1.0
    y_norm = 2.0 * yg.reshape(-1) / jnp.float32(height - 1) - 1.0
    z = jnp.stack([x_norm, y_norm], axis=-1)               # (S, 2)
    embed = jnp.sin(z @ Wp.T + bp[None, :])                # (S, E)

    wo_t = Wo.T                                            # (E+Cin, F)
    we, wx = wo_t[:E, :], wo_t[E:, :]                      # split the concat matmul
    bias_sf = (embed @ we + bo[None, :]).astype(jnp.float32)   # (S, F) fp32

    # Streamed operands run in the activation dtype (bf16-friendly); bias stays f32.
    wx = wx.astype(x.dtype)
    x_itemsize = jnp.dtype(x.dtype).itemsize

    # ---- per-generation VMEM budget + tile size --------------------------------
    vmem_cap = _vmem_capacity_bytes()
    vmem_limit = int(min(vmem_cap // 2, 48 * 1024 * 1024))   # ~48MiB v5e/v6e, 32MiB v7x
    budget = vmem_limit // 2                                  # headroom for pipeline/spills
    TS = _pick_seq_tile(S, Cin, F, x_itemsize, budget)
    n_s = S // TS

    cost = pl.CostEstimate(
        flops=2 * B * S * Cin * F,
        transcendentals=0,
        bytes_accessed=(
            x_itemsize * B * S * Cin      # x read
            + x_itemsize * B * S * F      # output write
            + x_itemsize * Cin * F        # wx (resident, read once)
            + 4 * S * F                   # bias (read once after grid reorder)
        ),
    )

    out = pl.pallas_call(
        _vit_input_kernel,
        out_shape=jax.ShapeDtypeStruct((B, S, F), x.dtype),
        grid_spec=pltpu.PrefetchScalarGridSpec(
            num_scalar_prefetch=0,
            # Sequence tiles OUTER, batch INNER: bias block index (s, 0) is
            # constant across consecutive steps -> bias tile stays resident.
            grid=(n_s, B),
            in_specs=[
                # x: per-(seq-tile, batch) block, batch dim squeezed away
                pl.BlockSpec((pl.Squeezed(), TS, Cin), lambda s, b: (b, s, 0)),
                # wx: resident weights
                pl.BlockSpec((Cin, F), lambda s, b: (0, 0)),
                # bias table: per-seq-tile block, batch-invariant
                pl.BlockSpec((TS, F), lambda s, b: (s, 0)),
            ],
            out_specs=pl.BlockSpec((pl.Squeezed(), TS, F), lambda s, b: (b, s, 0)),
        ),
        compiler_params=pltpu.CompilerParams(
            # Outer (sequence) axis megacore-sharded so per-core bias residency
            # survives; inner batch axis sequential to preserve the reuse.
            dimension_semantics=("parallel", "arbitrary"),
            vmem_limit_bytes=vmem_limit,
        ),
        cost_estimate=cost,
    )(x, wx, bias_sf)

    return out


def vit_input_reference(x, params, height, width):
    """Pure-JAX reference mirroring the PyTorch forward (fused concat matmul)."""
    Wp, bp = params["proj_w"], params["proj_b"]
    Wo, bo = params["out_w"], params["out_b"]
    xg, yg = jnp.meshgrid(
        jnp.arange(width, dtype=jnp.float32),
        jnp.arange(height, dtype=jnp.float32),
        indexing="ij",
    )
    x_flat = xg.reshape(1, -1)
    y_flat = yg.reshape(1, -1)
    x_norm = 2.0 * x_flat / (width - 1) - 1.0
    y_norm = 2.0 * y_flat / (height - 1) - 1.0
    z = jnp.concatenate([x_norm[..., None], y_norm[..., None]], axis=2)  # (1, S, 2)
    embed = jnp.sin(jnp.einsum("bsi,oi->bso", z, Wp) + bp)               # (1, S, E)
    embed = jnp.broadcast_to(embed, (x.shape[0],) + embed.shape[1:])
    result = jnp.concatenate([embed, x.astype(jnp.float32)], axis=2)
    return jnp.einsum("bsi,oi->bso", result, Wo) + bo


if __name__ == "__main__":
    B = 2
    H, W = 4, 4                 # height, width -> seq = W*H = 16
    S = H * W
    INPUT_FEATURES = 8
    EMBED_FEATURES = 16
    FEATURES = 32

    key = jax.random.PRNGKey(0)
    k_x, k_wp, k_bp, k_wo, k_bo = jax.random.split(key, 5)

    x = jax.random.normal(k_x, (B, S, INPUT_FEATURES), dtype=jnp.float32)

    # Deterministic synthetic parameters (torch nn.Linear layout: (out, in)).
    params = {
        "proj_w": 0.5 * jax.random.normal(k_wp, (EMBED_FEATURES, 2), dtype=jnp.float32),
        "proj_b": 0.1 * jax.random.normal(k_bp, (EMBED_FEATURES,), dtype=jnp.float32),
        "out_w": 0.1 * jax.random.normal(
            k_wo, (FEATURES, EMBED_FEATURES + INPUT_FEATURES), dtype=jnp.float32
        ),
        "out_b": 0.1 * jax.random.normal(k_bo, (FEATURES,), dtype=jnp.float32),
    }

    ref = vit_input_reference(x, params, H, W)

    # fp32 path: bit-tight parity with the PyTorch-equivalent reference.
    out_f32 = jax.block_until_ready(vit_input_pallas(x, params, H, W))
    assert out_f32.shape == (B, S, FEATURES)
    assert out_f32.dtype == jnp.float32
    assert jnp.allclose(out_f32, ref, atol=1e-5, rtol=1e-5), "fp32 mismatch vs reference"

    # bf16 activation path: halves the dominant HBM streams (looser tolerance).
    out_bf16 = jax.block_until_ready(
        vit_input_pallas(x.astype(jnp.bfloat16), params, H, W)
    )
    assert out_bf16.shape == (B, S, FEATURES)
    assert out_bf16.dtype == jnp.bfloat16
    assert jnp.allclose(
        out_bf16.astype(jnp.float32), ref, atol=5e-2, rtol=5e-2
    ), "bf16 mismatch vs reference"

    print("KERNEL_OK")
</pallas_src>

<mosaic_0001>
module attributes {stable_mosaic.version = 11 : i64} {
  func.func @_vit_input_kernel(%arg0: i32, %arg1: i32, %arg2: memref<1x16x8xf32, #tpu.memory_space<vmem>>, %arg3: memref<8x32xf32, #tpu.memory_space<vmem>>, %arg4: memref<16x32xf32, #tpu.memory_space<vmem>>, %arg5: memref<1x16x32xf32, #tpu.memory_space<vmem>>) attributes {dimension_semantics = [#tpu.dimension_semantics<parallel>, #tpu.dimension_semantics<arbitrary>], iteration_bounds = array<i64: 1, 2>, scalar_prefetch = 0 : i64, scratch_operands = 0 : i64, tpu.core_type = #tpu.core_type<tc>, window_params = [{transform_indices = @transform_0, window_bounds = array<i64: 1, 16, 8>}, {pipeline_mode = #tpu.pipeline_mode<synchronous>, transform_indices = @transform_1, window_bounds = array<i64: 8, 32>}, {transform_indices = @transform_2, window_bounds = array<i64: 16, 32>}, {transform_indices = @transform_3, window_bounds = array<i64: 1, 16, 32>}]} {
    %c0 = arith.constant 0 : index
    %c0_0 = arith.constant 0 : index
    %c0_1 = arith.constant 0 : index
    %0 = vector.load %arg2[%c0, %c0_0, %c0_1] : memref<1x16x8xf32, #tpu.memory_space<vmem>>, vector<1x16x8xf32>
    %1 = vector.shape_cast %0 : vector<1x16x8xf32> to vector<16x8xf32>
    %c0_2 = arith.constant 0 : index
    %c0_3 = arith.constant 0 : index
    %2 = vector.load %arg3[%c0_2, %c0_3] : memref<8x32xf32, #tpu.memory_space<vmem>>, vector<8x32xf32>
    %cst = arith.constant dense<0.000000e+00> : vector<16x32xf32>
    %3 = tpu.matmul %1, %2, %cst {dimension_numbers = #tpu.dot_dimension_numbers<[1], [0], [0], [1], [0, 0, 1, 1], [], []>} : vector<16x8xf32>, vector<8x32xf32>, vector<16x32xf32> -> vector<16x32xf32>
    %c0_4 = arith.constant 0 : index
    %c0_5 = arith.constant 0 : index
    %4 = vector.load %arg4[%c0_4, %c0_5] : memref<16x32xf32, #tpu.memory_space<vmem>>, vector<16x32xf32>
    %5 = arith.addf %3, %4 : vector<16x32xf32>
    %c0_6 = arith.constant 0 : index
    %c0_7 = arith.constant 0 : index
    %c0_8 = arith.constant 0 : index
    %6 = vector.load %arg5[%c0_6, %c0_7, %c0_8] : memref<1x16x32xf32, #tpu.memory_space<vmem>>, vector<1x16x32xf32>
    %7 = vector.shape_cast %6 : vector<1x16x32xf32> to vector<16x32xf32>
    %8 = vector.shape_cast %5 : vector<16x32xf32> to vector<1x16x32xf32>
    tpu.vector_store %arg5[%c0_6, %c0_7, %c0_8], %8 {strides = array<i32>} : memref<1x16x32xf32, #tpu.memory_space<vmem>>, vector<1x16x32xf32>,
    return
  }
  func.func @transform_0(%arg0: i32, %arg1: i32) -> (i32, i32, i32) {
    %c0_i32 = arith.constant 0 : i32
    %c0_i32_0 = arith.constant 0 : i32
    return %arg1, %arg0, %c0_i32 : i32, i32, i32
  }
  func.func @transform_1(%arg0: i32, %arg1: i32) -> (i32, i32) {
    %c0_i32 = arith.constant 0 : i32
    %c0_i32_0 = arith.constant 0 : i32
    %c0_i32_1 = arith.constant 0 : i32
    return %c0_i32, %c0_i32_0 : i32, i32
  }
  func.func @transform_2(%arg0: i32, %arg1: i32) -> (i32, i32) {
    %c0_i32 = arith.constant 0 : i32
    %c0_i32_0 = arith.constant 0 : i32
    return %arg0, %c0_i32 : i32, i32
  }
  func.func @transform_3(%arg0: i32, %arg1: i32) -> (i32, i32, i32) {
    %c0_i32 = arith.constant 0 : i32
    %c0_i32_0 = arith.constant 0 : i32
    return %arg1, %arg0, %c0_i32 : i32, i32, i32
  }
}

</mosaic_0001>

<bundles_post_ra>
// kernel: tpu_custom_call.1
= control target key start
LH: loop header
LB: loop body
LE: loop exit
PB: predicated region body
PF: predicated region fallthrough
CT: control target
= control target key end

     0   :  { %8 = vsyncpa [#allocation3], 0  ;;  %s732_s0 = inlined_call_operand.vmem [shape: f32[2,16,8], index: 0, kind: input, shape index: {}]   ;;  %s733_s1 = inlined_call_operand.vmem [shape: f32[8,32], index: 1, kind: input, shape index: {}]   ;;  %s734_s2 = inlined_call_operand.vmem [shape: f32[16,32], index: 2, kind: input, shape index: {}]   ;;  %s735_s3 = inlined_call_operand.hbm [shape: f32[2,16,32], index: 3, kind: output, shape index: {}]  }
   0x1   :  { %10 = vsyncpa [#allocation3 + $0x1], 0  ;;  %s608_s12 = smov 0   ;;  %s610_s13 = smov 0  }
   0x2   :  { %s612_s14 = smov 0   ;;  %s614_s15 = smov 0  }
   0x3   :  { %s616_s16 = smov 0   ;;  %s618_s17 = smov 0  }
   0x4 LB: > { %s422_s18 = sadd.s32 4294967295, %s583_s17   ;;  %s423_s19 = sadd.s32 4294967294, %s583_s17   ;;  %s583_s17 = sphi %s618_s17, %s16_s17   ;;  %s579_s16 = sphi %s616_s16, %s742_s16   ;;  %s575_s15 = sphi %s614_s15, %s741_s15   ;;  %s571_s14 = sphi %s612_s14, %s740_s14   ;;  %s567_s13 = sphi %s610_s13, %s739_s13   ;;  %s563_s12 = sphi %s608_s12, %s738_s12  }
   0x5   : > { %s25_s20 = sadd.s32 1, %s579_s16  ;;  %s112_s21 = sadd.s32 1, %s571_s14 }
   0x6   : > { %p26_p0 = scmp.ge.s32.totalorder %s25_s20, 2  ;;  %p122_p1 = scmp.ne.s32.totalorder %s571_s14, %s567_s13 }
   0x7   : > { %p123_p2 = scmp.eq.s32.totalorder %s422_s18, 1  ;;  %p128_p3 = scmp.ne.s32.totalorder %s567_s13, %s563_s12 }
   0x8   : > { %s744_s20 = smov (%p26_p0, %s25_s20), 0  ;;  %p129_p5 = scmp.eq.s32.totalorder %s423_s19, 1 }
   0x9   : > { %p648_p4 = por %p123_p2, %p122_p1  ;;  %s107_s23 = ssub.s32 %s579_s16, %s744_s20 }
   0xa   : > { %p427_p6 = scmp.ge.s32.totalorder %s583_s17, 1  ;;  %p110_p7 = scmp.eq.s32.totalorder %s107_s23, 0 }
   0xb   : > { %p655_p8 = por %p129_p5, %p128_p3  ;;  %p172_p9 = scmp.lt.s32.totalorder %s583_s17, 3 }
   0xc   : > { %s661_s25 = scalar_select %p110_p7, %s571_s14, %s112_s21  }
   0xd   : > { %p173_p10 = pnand %p427_p6, %p172_p9 }
   0xe   : > { %v224_v0 = vld [vmem:[%s733_s1] sm:$0xff] (!%p173_p10)  ;;  %p206_p11 = scmp.lt.s32.totalorder (!%p173_p10), %s575_s15, 1  ;;  %vm227_vm0 = vcmask (!%p173_p10), 64512   ;;  %s202_s6 = sand.u32 (!%p173_p10), 1, %s567_s13   ;;  %v226_v3 = vld [vmem:[%s734_s2 + $0x8] sm:$0xff] (!%p173_p10)  ;;  %vm309_vm1 = vcmask (!%p173_p10), 261120  }
   0xf   : > { %176 = sbr.rel (%p173_p10) target bundleno = 258 (0x102), region = 32  ;;  %443 = vmatprep.subr.mxu0 (!%p173_p10), %v224_v0  ;;  %s428_s7 = sshll.u32 (!%p173_p10), %s202_s6, 4  ;;  %v225_v4 = vld [vmem:[%s734_s2] sm:$0xff] (!%p173_p10) }
  0x10   : > { %444 = vmatpush3.msra.mxu0 (!%p173_p10), %v224_v0  ;;  %s204_s10 = scalar_lea.vmem (!%p173_p10), [#allocation2], %s428_s7  ;;  %s439_s18 = sshll.u32 (!%p173_p10), %s575_s15, 8 }
  0x11   : > { %s328_s11 = sshll.u32 (!%p173_p10), %s204_s10, 4  ;;  %s684_s27 = scalar_lea.hbm (!%p173_p10), %s735_s3, %s439_s18  ;;  %s679_s11 = int_to_ptr.vmem [resolvable:$true] %s328_s11 }
  0x16   : > { %s207_s28 = scalar_select %p206_p11, %s575_s15, 1 }
  0x17   : > { %s686_s15 = scalar_lea.sflag [#allocation3], %s202_s6 }
  0x18   : > { %s438_s29 = sshll.u32 %s207_s28, 4  ;;  %s505_s28 = scalar_lea.vmem %s679_s11, 256 }
  0x19   : > { %s213_s5 = scalar_lea.vmem %s732_s0, %s438_s29  ;;  %p506_p12 = scmp.ne.s32.totalorder %s679_s11, %s505_s28 }
  0x1a   : > { %v222_v1 = vld [vmem:[%s213_s5] sm:$0xff]  ;;  %v223_v2 = vld [vmem:[%s213_s5 + $0x8] sm:$0xff]  ;;  %s585_s29 = smov [#allocation2]  }
  0x1b   : > { %445 = vmatprep.mubr.msk.f32.mxu0 %vm227_vm0, %v222_v1  ;;  %p507_p13 = pnand %p506_p12, %p648_p4  ;;  %s509_s30 = sshll.u32 %s585_s29, 4  ;;  %s510_s30 = int_to_ptr.vmem [resolvable:$false] %s509_s30 }
  0x1c   : > { %446 = vmatmul.mubr.msk.f32.vlgmr.msra.gmra.mrb[0].mxu0 %vm227_vm0, %v223_v2  ;;  %s511_s4 = scalar_lea.vmem %s510_s30, 512  ;;  %p512_p1 = scmp.lt.s32.totalorder %s679_s11, %s510_s30 }
  0x1d   : > { %p508_p0 = pneg %p507_p13  ;;  %p513_p2 = scmp.lt.s32.totalorder %s511_s4, %s505_s28 }
  0x1f   : > { %p514_p3 = por %p513_p2, %p512_p1 }
  0x21   : > { %p515_p5 = pnand %p514_p3, %p508_p0 }
  0xef   : > { %v447_v5 = vpop.f32.mrb[0].mxu0 }
  0xf0   : > { %v306_v6 = vadd.f32 %v447_v5, %v226_v3  ;;  %v300_v7 = vpop.f32.mrb[1].mxu0 }
  0xf1   : > { %v301_v8 = vadd.f32 %v300_v7, %v225_v4 }
  0xf2   : > { %311 = vst.msk [vmem:[%s204_s10 + $0x8] sm:$0xff] %vm309_vm1, %v306_v6 }
  0xf3   : > { %310 = vst.msk [vmem:[%s204_s10] sm:$0xff] %vm309_vm1, %v301_v8 }
  0xf4   : > { %518 = shalt.err (!%p515_p5)
}
  0xf5   : > { %s519_s5 = scalar_lea.hbm %s684_s27, 256  ;;  %s523_s8 = scalar_lea.hbm %s735_s3, 512 }
  0xf6   : > { %p520_p6 = scmp.ne.s32.totalorder %s684_s27, %s519_s5  ;;  %p524_p10 = scmp.lt.u32.totalorder %s684_s27, %s735_s3 }
  0xf7   : > { %p525_p11 = scmp.lt.u32.totalorder %s523_s8, %s519_s5  ;;  %p527_p13 = scmp.lt.u32.totalorder %s519_s5, %s684_s27 }
  0xf8   : > { %p521_p7 = pnand %p520_p6, %p648_p4 }
  0xf9   : > { %p526_p12 = por %p525_p11, %p524_p10 }
  0xfa   : > { %p522_p9 = pneg %p521_p7 }
  0xfb   : > { %p528_p0 = por %p527_p13, %p526_p12 }
  0xfd   : > { %p529_p1 = pnand %p528_p0, %p522_p9 }
  0xff   : > { %532 = shalt.err (!%p529_p1)
}
 0x100   : > { %s586_s18 = smov 128   ;;  %s587_s19 = smov 8  }
 0x101   : > { %448 = dma.vmem_to_hbm [thread:$0]  (%p648_p4), %s679_s11, 256, %s684_s27, %s686_s15, %s586_s18, %s586_s18, %s587_s19  }
 0x102 PF: > { %p454_p2 = scmp.ge.s32.totalorder %s583_s17, 2  ;;  %s343_s21 = sand.u32 1, %s563_s12  }
 0x103   : > { %s344_s23 = scalar_lea.sflag [#allocation3], %s343_s21 }
 0x104   : > { %p451_p3 = pnand %p454_p2, %p655_p8 }
 0x106   : > { %558 = dma.done.wait (!%p451_p3), %s344_s23, 256  }
 0x107   : > { %560 = vsyncadd (!%p451_p3), %s344_s23, 4294967040  ;;  %s16_s17 = sadd.s32 1, %s583_s17   ;;  %s738_s12 = smov %s567_s13 }
 0x108   : > { %p13_p5 = scmp.ge.s32.totalorder %s16_s17, 4   ;;  %s739_s13 = smov %s571_s14 }
 0x109   : > { %s740_s14 = smov %s661_s25  ;;  %s741_s15 = smov %s579_s16 }
 0x10a   : > { %s742_s16 = smov %s744_s20  ;;  %15 = sbr.rel (!%p13_p5) target bundleno = 4 (0x4), region = 70 }
 0x111   :  { %349 = vsyncpa [#allocation3], 1 }
 0x112   :  { %351 = vsyncpa [#allocation3 + $0x1], 1 }

</bundles_post_ra>
